<compile_context>
chip_gen: v5e
topology: v5e:2x2
jax: 0.10.0
libtpu: 0.0.40
codegen_flags: <defaults>
</compile_context>

<pallas_src>
import numpy as np
import jax
import jax.numpy as jnp
from jax.experimental import pallas as pl
from jax.experimental.pallas import tpu as pltpu


def _round_up(x, m):
    return ((x + m - 1) // m) * m


# ---------------------------------------------------------------------------
# One-time parameter packing (hoisted out of the per-call path).
# ---------------------------------------------------------------------------
def prepare_lstm_params(params, matmul_dtype=jnp.bfloat16):
    """Pack weights into a lane-aligned gate-major layout and fold the biases.

    matmul_dtype=bfloat16 (default) is recommended on ALL generations
    (v5e/v6e/v7x run bf16 on the MXU at full rate); it halves weight HBM/VMEM
    bytes.  Gate math and the c state remain float32 inside the kernel.
    """
    w_ih = jnp.asarray(params["weight_ih"])   # (input_sz, 4*HS)
    w_hh = jnp.asarray(params["weight_hh"])   # (HS, 4*HS)
    input_sz = w_ih.shape[0]
    HS = w_hh.shape[0]
    if input_sz != HS:
        # bias_ih is declared (input_sz*4,) and is added to (batch, 4*HS) gates;
        # that only broadcasts when input_sz == hidden_sz (mirrors the module).
        raise ValueError(
            f"Normal_LSTMCell requires input_sz == hidden_sz for the bias add "
            f"to broadcast; got input_sz={input_sz}, hidden_sz={HS}.")

    HSp = _round_up(HS, 128)   # lane-aligned hidden width -> 128-aligned gate slices

    def pack(w, K):
        w = w.reshape(K, 4, HS)
        w = jnp.pad(w, ((0, 0), (0, 0), (0, HSp - HS)))   # zero-pad gate columns
        return w.reshape(K, 4 * HSp).astype(matmul_dtype)

    w_ih_packed = pack(w_ih, input_sz)                                   # (IN, 4*HSp)
    # Pad the recurrent contraction dim to HSp (h scratch is HSp wide; padded
    # rows are zero so the padded h columns contribute nothing).
    w_hh_packed = jnp.pad(pack(w_hh, HS), ((0, HSp - HS), (0, 0)))       # (HSp, 4*HSp)

    b = jnp.asarray(params["bias_ih"]) + jnp.asarray(params["bias_hh"])  # (4*HS,)
    b = jnp.pad(b.reshape(4, HS), ((0, 0), (0, HSp - HS)))
    b_packed = b.reshape(1, 4 * HSp).astype(jnp.float32)

    return {
        "w_ih": w_ih_packed,
        "w_hh": w_hh_packed,
        "bias": b_packed,
        "input_sz": input_sz,
        "hidden_sz": HS,
        "HSp": HSp,
        "matmul_dtype": matmul_dtype,
    }


# ---------------------------------------------------------------------------
# Kernel: whole time axis in one pallas_call; h/c persist in VMEM scratch.
# ---------------------------------------------------------------------------
def _make_lstm_seq_kernel(HS, HSp):
    pad = HSp != HS

    def kernel(x_ref, h0_ref, c0_ref, w_ih_ref, w_hh_ref, b_ref,
               h_seq_ref, c_fin_ref, h_sc, c_sc):
        t = pl.program_id(1)

        # t == 0: load the initial state into the per-tile VMEM scratch.  The
        # padded columns are zeroed once and stay exactly zero every step,
        # because the padded weight/bias columns are zero.
        @pl.when(t == 0)
        def _init():
            if pad:
                h_sc[...] = jnp.zeros_like(h_sc)
                c_sc[...] = jnp.zeros_like(c_sc)
            h_sc[:, :HS] = h0_ref[...].astype(h_sc.dtype)
            c_sc[:, :HS] = c0_ref[...].astype(c_sc.dtype)

        # gates = x_t @ W_ih + h_{t-1} @ W_hh + b     (f32 accumulation on MXU)
        x_t = x_ref[0].astype(w_ih_ref.dtype)
        gates = jnp.dot(x_t, w_ih_ref[...], preferred_element_type=jnp.float32)
        gates = gates + jnp.dot(h_sc[...], w_hh_ref[...],
                                preferred_element_type=jnp.float32)
        gates = gates + b_ref[...]

        # sigmoid(z) = 0.5*tanh(0.5*z) + 0.5 : one EUP op instead of exp+recip.
        def sigmoid(z):
            return 0.5 * jnp.tanh(0.5 * z) + 0.5

        # Each gate slice is an exact multiple-of-128-lane chunk (HSp % 128 == 0).
        i = sigmoid(gates[:, 0 * HSp:1 * HSp])
        f = sigmoid(gates[:, 1 * HSp:2 * HSp])
        g = jnp.tanh(gates[:, 2 * HSp:3 * HSp])
        o = sigmoid(gates[:, 3 * HSp:4 * HSp])

        c_new = f * c_sc[...] + i * g          # float32
        h_new = o * jnp.tanh(c_new)            # float32

        c_sc[...] = c_new                      # c state stays f32 across steps
        h_sc[...] = h_new.astype(h_sc.dtype)   # h stored in the MXU-feed dtype

        h_seq_ref[0] = h_new[:, :HS].astype(h_seq_ref.dtype)

        @pl.when(t == pl.num_programs(1) - 1)
        def _finalize():
            c_fin_ref[...] = c_new[:, :HS].astype(c_fin_ref.dtype)

    return kernel


# ---------------------------------------------------------------------------
# Sequence wrapper: ONE pallas_call for all T steps.
# ---------------------------------------------------------------------------
def lstm_sequence_forward(x_seq, prepared, hidden_state=None, *,
                          tile_m=256, single_buffer_weights=False):
    """x_seq: (T, batch, input_sz) -> (h_seq: (T, batch, HS), c_last: (batch, HS))."""
    T, batch, input_sz = x_seq.shape
    HS, HSp = prepared["hidden_sz"], prepared["HSp"]
    assert input_sz == prepared["input_sz"]
    dtype = x_seq.dtype
    mm_dtype = prepared["matmul_dtype"]

    if hidden_state is None:
        h0 = jnp.zeros((batch, HS), dtype=dtype)
        c0 = jnp.zeros((batch, HS), dtype=dtype)
    else:
        h0, c0 = hidden_state
        h0 = jnp.broadcast_to(h0, (batch, HS)).astype(dtype)
        c0 = jnp.broadcast_to(c0, (batch, HS)).astype(dtype)

    # Batch tiling: aim for >= 2 tiles whenever batch permits so the "parallel"
    # axis can shard across v7x's two TensorCores (harmless on v5e/v6e).
    if batch <= 8:
        tm = batch                                           # full-dim block
    else:
        tm = min(_round_up(tile_m, 8), _round_up(pl.cdiv(batch, 2), 8))
    n_m = pl.cdiv(batch, tm)

    # Explicit VMEM budget: weights(+bias) * buffer count + activation tiles
    # (double-buffered) + state scratch + headroom.  Floor at 32 MiB, cap below
    # physical VMEM on every generation.
    mm_isz = np.dtype(mm_dtype).itemsize
    io_isz = np.dtype(dtype).itemsize
    w_bufs = 1 if single_buffer_weights else 2
    weight_bytes = w_bufs * ((input_sz + HSp) * 4 * HSp * mm_isz + 4 * HSp * 4)
    tile_bytes = 2 * tm * (input_sz + 4 * HS) * io_isz
    scratch_bytes = tm * HSp * (mm_isz + 4)
    vmem_limit = int(min(max(weight_bytes + tile_bytes + scratch_bytes + (8 << 20),
                             32 << 20), 100 << 20))

    # Resident operands (constant index_map -> fetched once).  Opt-in
    # single-buffering halves their VMEM footprint on large-HS / v7x configs.
    w_kwargs = dict(pipeline_mode=pl.Buffered(1)) if single_buffer_weights else {}

    kernel = _make_lstm_seq_kernel(HS, HSp)
    h_seq, c_last = pl.pallas_call(
        kernel,
        out_shape=(
            jax.ShapeDtypeStruct((T, batch, HS), dtype),
            jax.ShapeDtypeStruct((batch, HS), dtype),
        ),
        grid=(n_m, T),
        in_specs=[
            pl.BlockSpec((1, tm, input_sz), lambda m, t: (t, m, 0)),           # x_t tile
            pl.BlockSpec((tm, HS), lambda m, t: (m, 0)),                       # h0 (t==0)
            pl.BlockSpec((tm, HS), lambda m, t: (m, 0)),                       # c0 (t==0)
            pl.BlockSpec((input_sz, 4 * HSp), lambda m, t: (0, 0), **w_kwargs),  # W_ih resident
            pl.BlockSpec((HSp, 4 * HSp), lambda m, t: (0, 0), **w_kwargs),       # W_hh resident
            pl.BlockSpec((1, 4 * HSp), lambda m, t: (0, 0), **w_kwargs),         # bias resident
        ],
        out_specs=(
            pl.BlockSpec((1, tm, HS), lambda m, t: (t, m, 0)),                 # h_t tile
            pl.BlockSpec((tm, HS), lambda m, t: (m, 0)),                       # final c
        ),
        scratch_shapes=[
            pltpu.VMEM((tm, HSp), mm_dtype),     # h state (MXU feed dtype)
            pltpu.VMEM((tm, HSp), jnp.float32),  # c state (f32 across steps)
        ],
        compiler_params=pltpu.CompilerParams(
            dimension_semantics=("parallel", "arbitrary"),
            vmem_limit_bytes=vmem_limit,
        ),
    )(x_seq, h0, c0, prepared["w_ih"], prepared["w_hh"], prepared["bias"])

    return h_seq, c_last


# ---------------------------------------------------------------------------
# Single-step forward (mirrors Normal_LSTMCell.forward).
# ---------------------------------------------------------------------------
def lstm_cell_forward(x, prepared, hidden_state=None, **kwargs):
    """x: (batch, input_sz) -> (h, c), each (batch, hidden_sz)."""
    h_seq, c = lstm_sequence_forward(x[None], prepared, hidden_state, **kwargs)
    return h_seq[0], c


# ---------------------------------------------------------------------------
# Init matching the PyTorch module (xavier_uniform_ for 2-D, zeros for 1-D).
# ---------------------------------------------------------------------------
def init_lstm_params(key, input_sz, hidden_sz, dtype=jnp.float32):
    k_ih, k_hh = jax.random.split(key, 2)

    def xavier_uniform(k, shape):
        fan_in, fan_out = shape
        limit = (6.0 / (fan_in + fan_out)) ** 0.5
        return jax.random.uniform(k, shape, dtype=dtype, minval=-limit, maxval=limit)

    return {
        "weight_ih": xavier_uniform(k_ih, (input_sz, hidden_sz * 4)),
        "weight_hh": xavier_uniform(k_hh, (hidden_sz, hidden_sz * 4)),
        "bias_ih": jnp.zeros((input_sz * 4,), dtype=dtype),
        "bias_hh": jnp.zeros((hidden_sz * 4,), dtype=dtype),
    }


# ---------------------------------------------------------------------------
# Pure-JAX references for verification.
# ---------------------------------------------------------------------------
def lstm_cell_reference(x, params, hidden_state=None):
    HS = params["weight_hh"].shape[0]
    if hidden_state is None:
        h = jnp.zeros((HS,), dtype=x.dtype)
        c = jnp.zeros((HS,), dtype=x.dtype)
    else:
        h, c = hidden_state
    gates = (x @ params["weight_ih"] + params["bias_ih"]
             + (h @ params["weight_hh"] + params["bias_hh"]))
    i = jax.nn.sigmoid(gates[:, :HS])
    f = jax.nn.sigmoid(gates[:, HS:2 * HS])
    g = jnp.tanh(gates[:, 2 * HS:3 * HS])
    o = jax.nn.sigmoid(gates[:, 3 * HS:])
    c_new = f * c + i * g
    h_new = o * jnp.tanh(c_new)
    return h_new, c_new


def lstm_sequence_reference(x_seq, params, hidden_state=None):
    HS = params["weight_hh"].shape[0]
    batch = x_seq.shape[1]
    if hidden_state is None:
        h = jnp.zeros((batch, HS), dtype=x_seq.dtype)
        c = jnp.zeros((batch, HS), dtype=x_seq.dtype)
    else:
        h, c = hidden_state
        h = jnp.broadcast_to(h, (batch, HS))
        c = jnp.broadcast_to(c, (batch, HS))
    hs = []
    for t in range(x_seq.shape[0]):
        h, c = lstm_cell_reference(x_seq[t], params, (h, c))
        hs.append(h)
    return jnp.stack(hs), c


if __name__ == "__main__":
    batch, input_sz, hidden_sz, T = 8, 32, 32, 6   # input_sz == hidden_sz (module constraint)

    key = jax.random.PRNGKey(0)
    k_p, k_x, k_h, k_c, k_b1, k_b2 = jax.random.split(key, 6)
    params = init_lstm_params(k_p, input_sz, hidden_sz)
    # Nonzero biases to exercise the bias fold (module init zeroes them, but the
    # forward pass must be correct for arbitrary parameter values).
    params["bias_ih"] = 0.1 * jax.random.normal(k_b1, (input_sz * 4,), jnp.float32)
    params["bias_hh"] = 0.1 * jax.random.normal(k_b2, (hidden_sz * 4,), jnp.float32)

    x_seq = jax.random.normal(k_x, (T, batch, input_sz), dtype=jnp.float32)
    h0 = jax.random.normal(k_h, (batch, hidden_sz), dtype=jnp.float32)
    c0 = jax.random.normal(k_c, (batch, hidden_sz), dtype=jnp.float32)

    # --- exact-precision path (f32 weights): tight tolerance ---
    prep32 = prepare_lstm_params(params, matmul_dtype=jnp.float32)

    # Case 1: single step, default (zero) hidden state.
    h1, c1 = lstm_cell_forward(x_seq[0], prep32)
    jax.block_until_ready((h1, c1))
    h1_ref, c1_ref = lstm_cell_reference(x_seq[0], params)
    assert h1.shape == (batch, hidden_sz) and c1.shape == (batch, hidden_sz)
    assert jnp.allclose(h1, h1_ref, atol=1e-4, rtol=1e-4)
    assert jnp.allclose(c1, c1_ref, atol=1e-4, rtol=1e-4)

    # Case 2: single step, provided hidden state (exercises the W_hh path).
    h2, c2 = lstm_cell_forward(x_seq[0], prep32, (h0, c0))
    jax.block_until_ready((h2, c2))
    h2_ref, c2_ref = lstm_cell_reference(x_seq[0], params, (h0, c0))
    assert jnp.allclose(h2, h2_ref, atol=1e-4, rtol=1e-4)
    assert jnp.allclose(c2, c2_ref, atol=1e-4, rtol=1e-4)

    # Case 3: whole sequence in ONE pallas_call (time loop inside the kernel).
    hs, c_last = lstm_sequence_forward(x_seq, prep32, (h0, c0))
    jax.block_until_ready((hs, c_last))
    hs_ref, c_last_ref = lstm_sequence_reference(x_seq, params, (h0, c0))
    assert hs.shape == (T, batch, hidden_sz)
    assert jnp.allclose(hs, hs_ref, atol=1e-3, rtol=1e-3)
    assert jnp.allclose(c_last, c_last_ref, atol=1e-3, rtol=1e-3)

    # Case 4: default bf16-weight path (recommended for production).  Recurrent
    # bf16 rounding accumulates over the sequence -> documented looser tolerance.
    prep_bf16 = prepare_lstm_params(params)
    hs_b, c_b = lstm_sequence_forward(x_seq, prep_bf16, (h0, c0))
    jax.block_until_ready((hs_b, c_b))
    assert jnp.allclose(hs_b, hs_ref, atol=1e-1, rtol=1e-1)
    assert jnp.allclose(c_b, c_last_ref, atol=1e-1, rtol=1e-1)

    print("KERNEL_OK")
</pallas_src>

<mosaic_0001>
module attributes {stable_mosaic.version = 11 : i64} {
  func.func @kernel(%arg0: i32, %arg1: i32, %arg2: memref<1x8x32xf32, #tpu.memory_space<vmem>>, %arg3: memref<8x32xf32, #tpu.memory_space<vmem>>, %arg4: memref<8x32xf32, #tpu.memory_space<vmem>>, %arg5: memref<32x512xf32, #tpu.memory_space<vmem>>, %arg6: memref<128x512xf32, #tpu.memory_space<vmem>>, %arg7: memref<1x512xf32, #tpu.memory_space<vmem>>, %arg8: memref<1x8x32xf32, #tpu.memory_space<vmem>>, %arg9: memref<8x32xf32, #tpu.memory_space<vmem>>, %arg10: memref<8x128xf32, #tpu.memory_space<vmem>>, %arg11: memref<8x128xf32, #tpu.memory_space<vmem>>) attributes {dimension_semantics = [#tpu.dimension_semantics<parallel>, #tpu.dimension_semantics<arbitrary>], iteration_bounds = array<i64: 1, 1>, scalar_prefetch = 0 : i64, scratch_operands = 2 : i64, tpu.core_type = #tpu.core_type<tc>, window_params = [{transform_indices = @transform_0, window_bounds = array<i64: 1, 8, 32>}, {transform_indices = @transform_1, window_bounds = array<i64: 8, 32>}, {transform_indices = @transform_2, window_bounds = array<i64: 8, 32>}, {pipeline_mode = #tpu.pipeline_mode<synchronous>, transform_indices = @transform_3, window_bounds = array<i64: 32, 512>}, {pipeline_mode = #tpu.pipeline_mode<synchronous>, transform_indices = @transform_4, window_bounds = array<i64: 128, 512>}, {pipeline_mode = #tpu.pipeline_mode<synchronous>, transform_indices = @transform_5, window_bounds = array<i64: 1, 512>}, {transform_indices = @transform_6, window_bounds = array<i64: 1, 8, 32>}, {transform_indices = @transform_7, window_bounds = array<i64: 8, 32>}]} {
    %c0_i32 = arith.constant 0 : i32
    %0 = arith.cmpi eq, %arg1, %c0_i32 : i32
    %1 = arith.extui %0 : i1 to i32
    %c0_i32_0 = arith.constant 0 : i32
    %2 = arith.cmpi ne, %1, %c0_i32_0 : i32
    scf.if %2 {
      %cst_32 = arith.constant 0.000000e+00 : f32
      %55 = vector.broadcast %cst_32 : f32 to vector<8x128xf32>
      %c0_33 = arith.constant 0 : index
      %c0_34 = arith.constant 0 : index
      %56 = vector.load %arg10[%c0_33, %c0_34] : memref<8x128xf32, #tpu.memory_space<vmem>>, vector<8x128xf32>
      tpu.vector_store %arg10[%c0_33, %c0_34], %55 {strides = array<i32>} : memref<8x128xf32, #tpu.memory_space<vmem>>, vector<8x128xf32>,
      %cst_35 = arith.constant 0.000000e+00 : f32
      %57 = vector.broadcast %cst_35 : f32 to vector<8x128xf32>
      %c0_36 = arith.constant 0 : index
      %c0_37 = arith.constant 0 : index
      %58 = vector.load %arg11[%c0_36, %c0_37] : memref<8x128xf32, #tpu.memory_space<vmem>>, vector<8x128xf32>
      tpu.vector_store %arg11[%c0_36, %c0_37], %57 {strides = array<i32>} : memref<8x128xf32, #tpu.memory_space<vmem>>, vector<8x128xf32>,
      %c0_38 = arith.constant 0 : index
      %c0_39 = arith.constant 0 : index
      %59 = vector.load %arg3[%c0_38, %c0_39] : memref<8x32xf32, #tpu.memory_space<vmem>>, vector<8x32xf32>
      %c0_40 = arith.constant 0 : index
      %c0_41 = arith.constant 0 : index
      %60 = vector.load %arg10[%c0_40, %c0_41] : memref<8x128xf32, #tpu.memory_space<vmem>>, vector<8x32xf32>
      tpu.vector_store %arg10[%c0_40, %c0_41], %59 {strides = array<i32>} : memref<8x128xf32, #tpu.memory_space<vmem>>, vector<8x32xf32>,
      %c0_42 = arith.constant 0 : index
      %c0_43 = arith.constant 0 : index
      %61 = vector.load %arg4[%c0_42, %c0_43] : memref<8x32xf32, #tpu.memory_space<vmem>>, vector<8x32xf32>
      %c0_44 = arith.constant 0 : index
      %c0_45 = arith.constant 0 : index
      %62 = vector.load %arg11[%c0_44, %c0_45] : memref<8x128xf32, #tpu.memory_space<vmem>>, vector<8x32xf32>
      tpu.vector_store %arg11[%c0_44, %c0_45], %61 {strides = array<i32>} : memref<8x128xf32, #tpu.memory_space<vmem>>, vector<8x32xf32>,
    } else {
    }
    %c0 = arith.constant 0 : index
    %c0_1 = arith.constant 0 : index
    %c0_2 = arith.constant 0 : index
    %3 = vector.load %arg2[%c0, %c0_1, %c0_2] : memref<1x8x32xf32, #tpu.memory_space<vmem>>, vector<1x8x32xf32>
    %4 = vector.shape_cast %3 : vector<1x8x32xf32> to vector<8x32xf32>
    %c0_3 = arith.constant 0 : index
    %c0_4 = arith.constant 0 : index
    %5 = vector.load %arg5[%c0_3, %c0_4] : memref<32x512xf32, #tpu.memory_space<vmem>>, vector<32x512xf32>
    %cst = arith.constant dense<0.000000e+00> : vector<8x512xf32>
    %6 = tpu.matmul %4, %5, %cst {dimension_numbers = #tpu.dot_dimension_numbers<[1], [0], [0], [1], [0, 0, 1, 1], [], []>} : vector<8x32xf32>, vector<32x512xf32>, vector<8x512xf32> -> vector<8x512xf32>
    %c0_5 = arith.constant 0 : index
    %c0_6 = arith.constant 0 : index
    %7 = vector.load %arg10[%c0_5, %c0_6] : memref<8x128xf32, #tpu.memory_space<vmem>>, vector<8x128xf32>
    %c0_7 = arith.constant 0 : index
    %c0_8 = arith.constant 0 : index
    %8 = vector.load %arg6[%c0_7, %c0_8] : memref<128x512xf32, #tpu.memory_space<vmem>>, vector<128x512xf32>
    %cst_9 = arith.constant dense<0.000000e+00> : vector<8x512xf32>
    %9 = tpu.matmul %7, %8, %cst_9 {dimension_numbers = #tpu.dot_dimension_numbers<[1], [0], [0], [1], [0, 0, 1, 1], [], []>} : vector<8x128xf32>, vector<128x512xf32>, vector<8x512xf32> -> vector<8x512xf32>
    %10 = arith.addf %6, %9 : vector<8x512xf32>
    %c0_10 = arith.constant 0 : index
    %c0_11 = arith.constant 0 : index
    %11 = vector.load %arg7[%c0_10, %c0_11] : memref<1x512xf32, #tpu.memory_space<vmem>>, vector<1x512xf32>
    %12 = vector.broadcast %11 : vector<1x512xf32> to vector<8x512xf32>
    %13 = arith.addf %10, %12 : vector<8x512xf32>
    %14 = vector.extract_strided_slice %13 {offsets = [0, 0], sizes = [8, 128], strides = [1, 1]} : vector<8x512xf32> to vector<8x128xf32>
    %cst_12 = arith.constant 5.000000e-01 : f32
    %15 = vector.broadcast %cst_12 : f32 to vector<8x128xf32>
    %16 = arith.mulf %15, %14 : vector<8x128xf32>
    %17 = math.tanh %16 : vector<8x128xf32>
    %cst_13 = arith.constant 5.000000e-01 : f32
    %18 = vector.broadcast %cst_13 : f32 to vector<8x128xf32>
    %19 = arith.mulf %18, %17 : vector<8x128xf32>
    %cst_14 = arith.constant 5.000000e-01 : f32
    %20 = vector.broadcast %cst_14 : f32 to vector<8x128xf32>
    %21 = arith.addf %19, %20 : vector<8x128xf32>
    %22 = vector.extract_strided_slice %13 {offsets = [0, 128], sizes = [8, 128], strides = [1, 1]} : vector<8x512xf32> to vector<8x128xf32>
    %cst_15 = arith.constant 5.000000e-01 : f32
    %23 = vector.broadcast %cst_15 : f32 to vector<8x128xf32>
    %24 = arith.mulf %23, %22 : vector<8x128xf32>
    %25 = math.tanh %24 : vector<8x128xf32>
    %cst_16 = arith.constant 5.000000e-01 : f32
    %26 = vector.broadcast %cst_16 : f32 to vector<8x128xf32>
    %27 = arith.mulf %26, %25 : vector<8x128xf32>
    %cst_17 = arith.constant 5.000000e-01 : f32
    %28 = vector.broadcast %cst_17 : f32 to vector<8x128xf32>
    %29 = arith.addf %27, %28 : vector<8x128xf32>
    %30 = vector.extract_strided_slice %13 {offsets = [0, 256], sizes = [8, 128], strides = [1, 1]} : vector<8x512xf32> to vector<8x128xf32>
    %31 = math.tanh %30 : vector<8x128xf32>
    %32 = vector.extract_strided_slice %13 {offsets = [0, 384], sizes = [8, 128], strides = [1, 1]} : vector<8x512xf32> to vector<8x128xf32>
    %cst_18 = arith.constant 5.000000e-01 : f32
    %33 = vector.broadcast %cst_18 : f32 to vector<8x128xf32>
    %34 = arith.mulf %33, %32 : vector<8x128xf32>
    %35 = math.tanh %34 : vector<8x128xf32>
    %cst_19 = arith.constant 5.000000e-01 : f32
    %36 = vector.broadcast %cst_19 : f32 to vector<8x128xf32>
    %37 = arith.mulf %36, %35 : vector<8x128xf32>
    %cst_20 = arith.constant 5.000000e-01 : f32
    %38 = vector.broadcast %cst_20 : f32 to vector<8x128xf32>
    %39 = arith.addf %37, %38 : vector<8x128xf32>
    %c0_21 = arith.constant 0 : index
    %c0_22 = arith.constant 0 : index
    %40 = vector.load %arg11[%c0_21, %c0_22] : memref<8x128xf32, #tpu.memory_space<vmem>>, vector<8x128xf32>
    %41 = arith.mulf %29, %40 : vector<8x128xf32>
    %42 = arith.mulf %21, %31 : vector<8x128xf32>
    %43 = arith.addf %41, %42 : vector<8x128xf32>
    %44 = math.tanh %43 : vector<8x128xf32>
    %45 = arith.mulf %39, %44 : vector<8x128xf32>
    %c0_23 = arith.constant 0 : index
    %c0_24 = arith.constant 0 : index
    %46 = vector.load %arg11[%c0_23, %c0_24] : memref<8x128xf32, #tpu.memory_space<vmem>>, vector<8x128xf32>
    tpu.vector_store %arg11[%c0_23, %c0_24], %43 {strides = array<i32>} : memref<8x128xf32, #tpu.memory_space<vmem>>, vector<8x128xf32>,
    %c0_25 = arith.constant 0 : index
    %c0_26 = arith.constant 0 : index
    %47 = vector.load %arg10[%c0_25, %c0_26] : memref<8x128xf32, #tpu.memory_space<vmem>>, vector<8x128xf32>
    tpu.vector_store %arg10[%c0_25, %c0_26], %45 {strides = array<i32>} : memref<8x128xf32, #tpu.memory_space<vmem>>, vector<8x128xf32>,
    %48 = vector.extract_strided_slice %45 {offsets = [0, 0], sizes = [8, 32], strides = [1, 1]} : vector<8x128xf32> to vector<8x32xf32>
    %c0_27 = arith.constant 0 : index
    %c0_28 = arith.constant 0 : index
    %c0_29 = arith.constant 0 : index
    %49 = vector.load %arg8[%c0_27, %c0_28, %c0_29] : memref<1x8x32xf32, #tpu.memory_space<vmem>>, vector<1x8x32xf32>
    %50 = vector.shape_cast %49 : vector<1x8x32xf32> to vector<8x32xf32>
    %51 = vector.shape_cast %48 : vector<8x32xf32> to vector<1x8x32xf32>
    tpu.vector_store %arg8[%c0_27, %c0_28, %c0_29], %51 {strides = array<i32>} : memref<1x8x32xf32, #tpu.memory_space<vmem>>, vector<1x8x32xf32>,
    %c0_i32_30 = arith.constant 0 : i32
    %52 = arith.cmpi eq, %arg1, %c0_i32_30 : i32
    %53 = arith.extui %52 : i1 to i32
    %c0_i32_31 = arith.constant 0 : i32
    %54 = arith.cmpi ne, %53, %c0_i32_31 : i32
    scf.if %54 {
      %55 = vector.extract_strided_slice %43 {offsets = [0, 0], sizes = [8, 32], strides = [1, 1]} : vector<8x128xf32> to vector<8x32xf32>
      %c0_32 = arith.constant 0 : index
      %c0_33 = arith.constant 0 : index
      %56 = vector.load %arg9[%c0_32, %c0_33] : memref<8x32xf32, #tpu.memory_space<vmem>>, vector<8x32xf32>
      tpu.vector_store %arg9[%c0_32, %c0_33], %55 {strides = array<i32>} : memref<8x32xf32, #tpu.memory_space<vmem>>, vector<8x32xf32>,
    } else {
    }
    return
  }
  func.func @transform_0(%arg0: i32, %arg1: i32) -> (i32, i32, i32) {
    %c0_i32 = arith.constant 0 : i32
    %c0_i32_0 = arith.constant 0 : i32
    return %arg1, %arg0, %c0_i32 : i32, i32, i32
  }
  func.func @transform_1(%arg0: i32, %arg1: i32) -> (i32, i32) {
    %c0_i32 = arith.constant 0 : i32
    %c0_i32_0 = arith.constant 0 : i32
    return %arg0, %c0_i32 : i32, i32
  }
  func.func @transform_2(%arg0: i32, %arg1: i32) -> (i32, i32) {
    %c0_i32 = arith.constant 0 : i32
    %c0_i32_0 = arith.constant 0 : i32
    return %arg0, %c0_i32 : i32, i32
  }
  func.func @transform_3(%arg0: i32, %arg1: i32) -> (i32, i32) {
    %c0_i32 = arith.constant 0 : i32
    %c0_i32_0 = arith.constant 0 : i32
    %c0_i32_1 = arith.constant 0 : i32
    return %c0_i32, %c0_i32_0 : i32, i32
  }
  func.func @transform_4(%arg0: i32, %arg1: i32) -> (i32, i32) {
    %c0_i32 = arith.constant 0 : i32
    %c0_i32_0 = arith.constant 0 : i32
    %c0_i32_1 = arith.constant 0 : i32
    return %c0_i32, %c0_i32_0 : i32, i32
  }
  func.func @transform_5(%arg0: i32, %arg1: i32) -> (i32, i32) {
    %c0_i32 = arith.constant 0 : i32
    %c0_i32_0 = arith.constant 0 : i32
    %c0_i32_1 = arith.constant 0 : i32
    return %c0_i32, %c0_i32_0 : i32, i32
  }
  func.func @transform_6(%arg0: i32, %arg1: i32) -> (i32, i32, i32) {
    %c0_i32 = arith.constant 0 : i32
    %c0_i32_0 = arith.constant 0 : i32
    return %arg1, %arg0, %c0_i32 : i32, i32, i32
  }
  func.func @transform_7(%arg0: i32, %arg1: i32) -> (i32, i32) {
    %c0_i32 = arith.constant 0 : i32
    %c0_i32_0 = arith.constant 0 : i32
    return %arg0, %c0_i32 : i32, i32
  }
}

</mosaic_0001>

<bundles_post_ra>
// kernel: tpu_custom_call.1
= control target key start
LH: loop header
LB: loop body
LE: loop exit
PB: predicated region body
PF: predicated region fallthrough
CT: control target
= control target key end

     0   :  { %13 = vsyncpa [#allocation5], 0  ;;  %s715_s0 = inlined_call_operand.hbm [shape: f32[1,8,32], index: 0, kind: input, shape index: {}]   ;;  %s716_s1 = inlined_call_operand.hbm [shape: f32[8,32], index: 1, kind: input, shape index: {}]   ;;  %s717_s2 = inlined_call_operand.hbm [shape: f32[8,32], index: 2, kind: input, shape index: {}]   ;;  %s718_s3 = inlined_call_operand.hbm [shape: f32[32,512], index: 3, kind: input, shape index: {}]   ;;  %s719_s4 = inlined_call_operand.hbm [shape: f32[128,512], index: 4, kind: input, shape index: {}]   ;;  %s720_s5 = inlined_call_operand.vmem [shape: f32[1,512], index: 5, kind: input, shape index: {}]   ;;  %s721_s6 = inlined_call_operand.hbm [shape: f32[1,8,32], index: 6, kind: output, shape index: {0}]   ;;  %s722_s7 = inlined_call_operand.hbm [shape: f32[8,32], index: 7, kind: output, shape index: {1}]  }
   0x1   :  { %14 = vsyncpa [#allocation8], 0 }
   0x2   :  { %15 = vsyncpa [#allocation11], 0 }
   0x3   :  { %16 = vsyncpa [#allocation6], 0  ;;  %s34_s26 = sshll.u32 %s716_s1, 4  ;;  %s35_s26 = int_to_ptr.hbm [resolvable:$true] %s34_s26 }
   0x4   :  { %17 = vsyncpa [#allocation15], 0  ;;  %s633_s27 = smov [#allocation7]   ;;  %s55_s8 = sshll.u32 %s718_s3, 4  ;;  %s56_s8 = int_to_ptr.hbm [resolvable:$true] %s55_s8 }
   0x5   :  { %s36_s28 = sshll.u32 %s633_s27, 4  ;;  %s634_s9 = smov [#allocation10]   ;;  %s37_s28 = int_to_ptr.vmem [resolvable:$true] %s36_s28 }
   0x6   :  { %39 = dma.hbm_to_vmem [thread:$0]  %s35_s26, 128, %s37_s28, [#allocation8]  }
   0x7   :  { %s57_s10 = sshll.u32 %s634_s9, 4  ;;  %s635_s11 = smov 512   ;;  %s58_s10 = int_to_ptr.vmem [resolvable:$true] %s57_s10 }
   0x8   :  { %s636_s12 = smov 32   ;;  %s23_s1 = sshll.u32 %s715_s0, 4  ;;  %s24_s1 = int_to_ptr.hbm [resolvable:$true] %s23_s1 }
   0x9   :  { %63 = dma.hbm_to_vmem [thread:$0]  %s56_s8, 2048, %s58_s10, [#allocation11], %s635_s11, %s635_s11, %s636_s12  }
   0xa   :  { %s637_s15 = smov [#allocation4]   ;;  %s45_s3 = sshll.u32 %s717_s2, 4  ;;  %s46_s3 = int_to_ptr.hbm [resolvable:$true] %s45_s3 }
   0xb   :  { %s25_s16 = sshll.u32 %s637_s15, 4  ;;  %s638_s19 = smov [#allocation9]   ;;  %s26_s16 = int_to_ptr.vmem [resolvable:$true] %s25_s16 }
   0xc   :  { %28 = dma.hbm_to_vmem [thread:$0]  %s24_s1, 128, %s26_s16, [#allocation5]  }
   0xd   :  { %s47_s20 = sshll.u32 %s638_s19, 4  ;;  %s68_s23 = sshll.u32 %s719_s4, 4  ;;  %s48_s20 = int_to_ptr.vmem [resolvable:$true] %s47_s20  ;;  %s69_s23 = int_to_ptr.hbm [resolvable:$true] %s68_s23 }
   0xe   :  { %50 = dma.hbm_to_vmem [thread:$0]  %s46_s3, 128, %s48_s20, [#allocation8]  }
   0xf   :  { %s639_s0 = smov [#allocation12]  }
  0x10   :  { %s70_s24 = sshll.u32 %s639_s0, 4  ;;  %s71_s24 = int_to_ptr.vmem [resolvable:$true] %s70_s24 }
  0x11   :  { %76 = dma.hbm_to_vmem [thread:$0]  %s69_s23, 8192, %s71_s24, [#allocation11], %s635_s11, %s635_s11, %s636_s12  }
  0x12   :  { %623 = dma.done.wait [#allocation5], 128  }
  0x13   :  { %624 = vsyncadd [#allocation5], 4294967168 }
  0x14   :  { %625 = dma.done.wait [#allocation8], 256  }
  0x15   :  { %626 = vsyncadd [#allocation8], 4294967040 }
  0x16   :  { %627 = dma.done.wait [#allocation11], 10240  }
  0x17   :  { %628 = vsyncadd [#allocation11], 4294957056  ;;  %v640_v0 = vmov 0.0   ;;  %v188_v1 = vld [vmem:[#allocation12 + $0x1e0] sm:$0xff]  ;;  %v189_v2 = vld [vmem:[#allocation12 + $0x1e8] sm:$0xff]  ;;  %vm106_vm0 = vcmask 261120  }
  0x18   :  { %103 = vst [vmem:[#allocation2] sm:$0xff] %v640_v0  ;;  %v190_v3 = vld [vmem:[#allocation12 + $0x1f0] sm:$0xff]  ;;  %192 = vmatpush.msra.mxu0 %v188_v1  ;;  %212 = vmatpush.msra.mxu1 %v189_v2  ;;  %v191_v4 = vld [vmem:[#allocation12 + $0x1f8] sm:$0xff]  ;;  %v184_v5 = vld [vmem:[#allocation12 + $0x1c0] sm:$0xff]  ;;  %s414_s28 = sshll.u32 %s722_s7, 4  ;;  %s642_s29 = smov [#allocation13]   ;;  %s415_s28 = int_to_ptr.hbm [resolvable:$true] %s414_s28 }
  0x19   :  { %104 = vst [vmem:[#allocation3] sm:$0xff] %v640_v0  ;;  %v185_v6 = vld [vmem:[#allocation12 + $0x1c8] sm:$0xff]  ;;  %232 = vmatpush.msra.mxu2 %v190_v3  ;;  %252 = vmatpush.msra.mxu3 %v191_v4  ;;  %v186_v7 = vld [vmem:[#allocation12 + $0x1d0] sm:$0xff]  ;;  %v187_v8 = vld [vmem:[#allocation12 + $0x1d8] sm:$0xff]  ;;  %s401_s30 = sshll.u32 %s642_s29, 4  ;;  %s403_s10 = sshll.u32 %s721_s6, 4  ;;  %s402_s30 = int_to_ptr.vmem [resolvable:$true] %s401_s30  ;;  %s404_s10 = int_to_ptr.hbm [resolvable:$true] %s403_s10 }
  0x1a   :  { %v180_v9 = vld [vmem:[#allocation12 + $0x1a0] sm:$0xff]  ;;  %193 = vmatpush.msra.mxu0 %v184_v5  ;;  %213 = vmatpush.msra.mxu1 %v185_v6  ;;  %v181_v10 = vld [vmem:[#allocation12 + $0x1a8] sm:$0xff]  ;;  %v182_v11 = vld [vmem:[#allocation12 + $0x1b0] sm:$0xff] }
  0x1b   :  { %v183_v12 = vld [vmem:[#allocation12 + $0x1b8] sm:$0xff]  ;;  %233 = vmatpush.msra.mxu2 %v186_v7  ;;  %253 = vmatpush.msra.mxu3 %v187_v8  ;;  %v176_v13 = vld [vmem:[#allocation12 + $0x180] sm:$0xff]  ;;  %v177_v14 = vld [vmem:[#allocation12 + $0x188] sm:$0xff] }
  0x1c   :  { %194 = vmatpush.msra.mxu0 %v180_v9  ;;  %214 = vmatpush.msra.mxu1 %v181_v10  ;;  %v178_v15 = vld [vmem:[#allocation12 + $0x190] sm:$0xff]  ;;  %v179_v16 = vld [vmem:[#allocation12 + $0x198] sm:$0xff]  ;;  %v172_v17 = vld [vmem:[#allocation12 + $0x160] sm:$0xff] }
  0x1d   :  { %234 = vmatpush.msra.mxu2 %v182_v11  ;;  %254 = vmatpush.msra.mxu3 %v183_v12  ;;  %v173_v18 = vld [vmem:[#allocation12 + $0x168] sm:$0xff]  ;;  %v174_v19 = vld [vmem:[#allocation12 + $0x170] sm:$0xff]  ;;  %v175_v20 = vld [vmem:[#allocation12 + $0x178] sm:$0xff] }
  0x1e   :  { %195 = vmatpush.msra.mxu0 %v176_v13  ;;  %215 = vmatpush.msra.mxu1 %v177_v14  ;;  %v168_v21 = vld [vmem:[#allocation12 + $0x140] sm:$0xff]  ;;  %v169_v22 = vld [vmem:[#allocation12 + $0x148] sm:$0xff]  ;;  %v170_v23 = vld [vmem:[#allocation12 + $0x150] sm:$0xff] }
  0x1f   :  { %235 = vmatpush.msra.mxu2 %v178_v15  ;;  %255 = vmatpush.msra.mxu3 %v179_v16  ;;  %v171_v24 = vld [vmem:[#allocation12 + $0x158] sm:$0xff]  ;;  %v164_v25 = vld [vmem:[#allocation12 + $0x120] sm:$0xff]  ;;  %v165_v26 = vld [vmem:[#allocation12 + $0x128] sm:$0xff] }
  0x20   :  { %196 = vmatpush.msra.mxu0 %v172_v17  ;;  %216 = vmatpush.msra.mxu1 %v173_v18  ;;  %v166_v27 = vld [vmem:[#allocation12 + $0x130] sm:$0xff]  ;;  %v167_v28 = vld [vmem:[#allocation12 + $0x138] sm:$0xff]  ;;  %v160_v29 = vld [vmem:[#allocation12 + $0x100] sm:$0xff] }
  0x21   :  { %236 = vmatpush.msra.mxu2 %v174_v19  ;;  %256 = vmatpush.msra.mxu3 %v175_v20  ;;  %v161_v30 = vld [vmem:[#allocation12 + $0x108] sm:$0xff]  ;;  %v162_v31 = vld [vmem:[#allocation12 + $0x110] sm:$0xff]  ;;  %v163_v32 = vld [vmem:[#allocation12 + $0x118] sm:$0xff] }
  0x22   :  { %197 = vmatpush.msra.mxu0 %v168_v21  ;;  %217 = vmatpush.msra.mxu1 %v169_v22  ;;  %v156_v33 = vld [vmem:[#allocation12 + $0xe0] sm:$0xff]  ;;  %v157_v34 = vld [vmem:[#allocation12 + $0xe8] sm:$0xff]  ;;  %v158_v35 = vld [vmem:[#allocation12 + $0xf0] sm:$0xff] }
  0x23   :  { %237 = vmatpush.msra.mxu2 %v170_v23  ;;  %257 = vmatpush.msra.mxu3 %v171_v24  ;;  %v159_v36 = vld [vmem:[#allocation12 + $0xf8] sm:$0xff]  ;;  %v152_v37 = vld [vmem:[#allocation12 + $0xc0] sm:$0xff]  ;;  %v153_v38 = vld [vmem:[#allocation12 + $0xc8] sm:$0xff] }
  0x24   :  { %198 = vmatpush.msra.mxu0 %v164_v25  ;;  %218 = vmatpush.msra.mxu1 %v165_v26  ;;  %v154_v39 = vld [vmem:[#allocation12 + $0xd0] sm:$0xff]  ;;  %v155_v40 = vld [vmem:[#allocation12 + $0xd8] sm:$0xff]  ;;  %v148_v41 = vld [vmem:[#allocation12 + $0xa0] sm:$0xff] }
  0x25   :  { %238 = vmatpush.msra.mxu2 %v166_v27  ;;  %258 = vmatpush.msra.mxu3 %v167_v28  ;;  %v149_v42 = vld [vmem:[#allocation12 + $0xa8] sm:$0xff]  ;;  %v150_v43 = vld [vmem:[#allocation12 + $0xb0] sm:$0xff]  ;;  %v151_v44 = vld [vmem:[#allocation12 + $0xb8] sm:$0xff] }
  0x26   :  { %199 = vmatpush.msra.mxu0 %v160_v29  ;;  %219 = vmatpush.msra.mxu1 %v161_v30  ;;  %v144_v45 = vld [vmem:[#allocation12 + $0x80] sm:$0xff]  ;;  %v145_v46 = vld [vmem:[#allocation12 + $0x88] sm:$0xff]  ;;  %v146_v47 = vld [vmem:[#allocation12 + $0x90] sm:$0xff] }
  0x27   :  { %239 = vmatpush.msra.mxu2 %v162_v31  ;;  %259 = vmatpush.msra.mxu3 %v163_v32  ;;  %v147_v48 = vld [vmem:[#allocation12 + $0x98] sm:$0xff]  ;;  %v105_v49 = vld [vmem:[#allocation7] sm:$0xff]  ;;  %v140_v50 = vld [vmem:[#allocation12 + $0x60] sm:$0xff] }
  0x28   :  { %200 = vmatpush.msra.mxu0 %v156_v33  ;;  %220 = vmatpush.msra.mxu1 %v157_v34  ;;  %v141_v51 = vld [vmem:[#allocation12 + $0x68] sm:$0xff]  ;;  %107 = vst.msk [vmem:[#allocation2] sm:$0xff] %vm106_vm0, %v105_v49  ;;  %v142_v52 = vld [vmem:[#allocation12 + $0x70] sm:$0xff]  ;;  %v143_v53 = vld [vmem:[#allocation12 + $0x78] sm:$0xff] }
  0x29   :  { %240 = vmatpush.msra.mxu2 %v158_v35  ;;  %260 = vmatpush.msra.mxu3 %v159_v36  ;;  %v136_v54 = vld [vmem:[#allocation12 + $0x40] sm:$0xff]  ;;  %v137_v55 = vld [vmem:[#allocation12 + $0x48] sm:$0xff]  ;;  %v138_v56 = vld [vmem:[#allocation12 + $0x50] sm:$0xff] }
  0x2a   :  { %201 = vmatpush.msra.mxu0 %v152_v37  ;;  %221 = vmatpush.msra.mxu1 %v153_v38  ;;  %v139_v57 = vld [vmem:[#allocation12 + $0x58] sm:$0xff]  ;;  %v132_v58 = vld [vmem:[#allocation12 + $0x20] sm:$0xff]  ;;  %v133_v59 = vld [vmem:[#allocation12 + $0x28] sm:$0xff] }
  0x2b   :  { %241 = vmatpush.msra.mxu2 %v154_v39  ;;  %261 = vmatpush.msra.mxu3 %v155_v40  ;;  %v134_v60 = vld [vmem:[#allocation12 + $0x30] sm:$0xff]  ;;  %v135_v61 = vld [vmem:[#allocation12 + $0x38] sm:$0xff]  ;;  %v128_v62 = vld [vmem:[#allocation12] sm:$0xff] }
  0x2c   :  { %202 = vmatpush.msra.mxu0 %v148_v41  ;;  %222 = vmatpush.msra.mxu1 %v149_v42  ;;  %v129_v63 = vld [vmem:[#allocation12 + $0x8] sm:$0xff]  ;;  %v130_v0 = vld [vmem:[#allocation12 + $0x10] sm:$0xff]  ;;  %v131_v1 = vld [vmem:[#allocation12 + $0x18] sm:$0xff] }
  0x2d   :  { %242 = vmatpush.msra.mxu2 %v150_v43  ;;  %262 = vmatpush.msra.mxu3 %v151_v44  ;;  %v123_v3 = vld [vmem:[#allocation10 + $0x60] sm:$0xff]  ;;  %v124_v4 = vld [vmem:[#allocation10 + $0x68] sm:$0xff]  ;;  %v125_v5 = vld [vmem:[#allocation10 + $0x70] sm:$0xff] }
  0x2e   :  { %203 = vmatpush.msra.mxu0 %v144_v45  ;;  %223 = vmatpush.msra.mxu1 %v145_v46  ;;  %v126_v6 = vld [vmem:[#allocation10 + $0x78] sm:$0xff]  ;;  %v119_v7 = vld [vmem:[#allocation10 + $0x40] sm:$0xff]  ;;  %v120_v8 = vld [vmem:[#allocation10 + $0x48] sm:$0xff] }
  0x2f   :  { %243 = vmatpush.msra.mxu2 %v146_v47  ;;  %263 = vmatpush.msra.mxu3 %v147_v48  ;;  %v127_v2 = vld [vmem:[#allocation2] sm:$0xff]  ;;  %v121_v9 = vld [vmem:[#allocation10 + $0x50] sm:$0xff]  ;;  %v115_v11 = vld [vmem:[#allocation10 + $0x20] sm:$0xff] }
  0x30   :  { %204 = vmatpush.msra.mxu0 %v140_v50  ;;  %224 = vmatpush.msra.mxu1 %v141_v51  ;;  %v122_v10 = vld [vmem:[#allocation10 + $0x58] sm:$0xff]  ;;  %v116_v12 = vld [vmem:[#allocation10 + $0x28] sm:$0xff]  ;;  %v117_v13 = vld [vmem:[#allocation10 + $0x30] sm:$0xff] }
  0x31   :  { %244 = vmatpush.msra.mxu2 %v142_v52  ;;  %264 = vmatpush.msra.mxu3 %v143_v53  ;;  %v118_v14 = vld [vmem:[#allocation10 + $0x38] sm:$0xff]  ;;  %v111_v15 = vld [vmem:[#allocation10] sm:$0xff]  ;;  %v112_v16 = vld [vmem:[#allocation10 + $0x8] sm:$0xff] }
  0x32   :  { %205 = vmatpush.msra.mxu0 %v136_v54  ;;  %225 = vmatpush.msra.mxu1 %v137_v55  ;;  %v113_v17 = vld [vmem:[#allocation10 + $0x10] sm:$0xff]  ;;  %v114_v18 = vld [vmem:[#allocation10 + $0x18] sm:$0xff]  ;;  %v110_v19 = vld [vmem:[#allocation4] sm:$0xff] }
  0x33   :  { %245 = vmatpush.msra.mxu2 %v138_v56  ;;  %265 = vmatpush.msra.mxu3 %v139_v57  ;;  %v108_v20 = vld [vmem:[#allocation9] sm:$0xff] }
  0x34   :  { %206 = vmatpush.msra.mxu0 %v132_v58  ;;  %226 = vmatpush.msra.mxu1 %v133_v59  ;;  %109 = vst.msk [vmem:[#allocation3] sm:$0xff] %vm106_vm0, %v108_v20  ;;  %v356_v23 = vld [vmem:[%s720_s5] sm:$0xf]  ;;  %s641_s5 = smov [#allocation14]  }
  0x35   :  { %246 = vmatpush.msra.mxu2 %v134_v60  ;;  %266 = vmatpush.msra.mxu3 %v135_v61  ;;  %v358_v26 = vperm.slane %v356_v23, 0  ;;  %v359_v27 = vperm.slane %v356_v23, 1  ;;  %v360_v36 = vperm.slane %v356_v23, 2  ;;  %v361_v37 = vperm.slane %v356_v23, 3  ;;  %s412_s25 = sshll.u32 %s641_s5, 4  ;;  %s413_s25 = int_to_ptr.vmem [resolvable:$true] %s412_s25 }
  0x36   :  { %207 = vmatpush.msra.mxu0 %v128_v62  ;;  %227 = vmatpush.msra.mxu1 %v129_v63 }
  0x37   :  { %247 = vmatpush.msra.mxu2 %v130_v0  ;;  %267 = vmatpush.msra.mxu3 %v131_v1 }
  0x38   :  { %208 = vmatmul.f32.vlgmr.msra.gmra.mxu0 %v127_v2  ;;  %228 = vmatmul.f32.vlgmr.msra.gmra.mxu1 %v127_v2 }
  0x39   :  { %248 = vmatmul.f32.vlgmr.msra.gmra.mxu2 %v127_v2  ;;  %268 = vmatmul.f32.vlgmr.msra.gmra.mxu3 %v127_v2 }
  0x3a   :  { %288 = vmatpush.msrb.mxu0 %v123_v3  ;;  %308 = vmatpush.msrb.mxu1 %v124_v4 }
  0x3b   :  { %328 = vmatpush.msrb.mxu2 %v125_v5  ;;  %348 = vmatpush.msrb.mxu3 %v126_v6  ;;  %v383_v50 = vld [vmem:[#allocation3] sm:$0xff] }
  0x3c   :  { %289 = vmatpush.msrb.mxu0 %v119_v7  ;;  %309 = vmatpush.msrb.mxu1 %v120_v8 }
  0x3d   :  { %329 = vmatpush.msrb.mxu2 %v121_v9  ;;  %349 = vmatpush.msrb.mxu3 %v122_v10 }
  0x3e   :  { %290 = vmatpush.msrb.mxu0 %v115_v11  ;;  %310 = vmatpush.msrb.mxu1 %v116_v12 }
  0x3f   :  { %330 = vmatpush.msrb.mxu2 %v117_v13  ;;  %350 = vmatpush.msrb.mxu3 %v118_v14 }
  0x40   :  { %291 = vmatpush.msrb.mxu0 %v111_v15  ;;  %311 = vmatpush.msrb.mxu1 %v112_v16 }
  0x41   :  { %331 = vmatpush.msrb.mxu2 %v113_v17  ;;  %351 = vmatpush.msrb.mxu3 %v114_v18 }
  0x42   :  { %431 = vmatmul.msk.f32.vlgmr.msrb.gmra.mxu0 %vm106_vm0, %v110_v19  ;;  %432 = vmatmul.msk.f32.vlgmr.msrb.gmra.mxu1 %vm106_vm0, %v110_v19 }
  0x43   :  { %433 = vmatmul.msk.f32.vlgmr.msrb.gmra.mxu2 %vm106_vm0, %v110_v19  ;;  %434 = vmatmul.msk.f32.vlgmr.msrb.gmra.mxu3 %vm106_vm0, %v110_v19 }
  0xb5   :  { %v209_v21 = vpop.f32.mrf.mxu0  ;;  %v229_v22 = vpop.f32.mrf.mxu1 }
  0xbc   :  { %v249_v24 = vpop.f32.mrf.mxu2  ;;  %v269_v25 = vpop.f32.mrf.mxu3 }
  0xbf   :  { %v293_v28 = vpop.f32.mrf.mxu0  ;;  %v313_v29 = vpop.f32.mrf.mxu1 }
  0xc0   :  { %v294_v30 = vadd.f32 %v293_v28, %v209_v21  ;;  %v314_v31 = vadd.f32 %v313_v29, %v229_v22 }
  0xc2   :  { %v366_v32 = vadd.f32 %v358_v26, %v294_v30  ;;  %v367_v33 = vadd.f32 %v359_v27, %v314_v31 }
  0xc4   :  { %v370_v34 = vmul.f32 0.5, %v366_v32  ;;  %v374_v35 = vmul.f32 0.5, %v367_v33 }
  0xc6   :  { %445 = vtanh.f32 %v370_v34  ;;  %v333_v38 = vpop.f32.mrf.mxu2  ;;  %v353_v39 = vpop.f32.mrf.mxu3 }
  0xc7   :  { %447 = vtanh.f32 %v374_v35  ;;  %v334_v40 = vadd.f32 %v333_v38, %v249_v24  ;;  %v354_v41 = vadd.f32 %v353_v39, %v269_v25 }
  0xc9   :  { %v368_v42 = vadd.f32 %v360_v36, %v334_v40  ;;  %v369_v43 = vadd.f32 %v361_v37, %v354_v41 }
  0xcb   :  { %449 = vtanh.f32 %v368_v42  ;;  %v379_v44 = vmul.f32 0.5, %v369_v43 }
  0xcc   :  { %v446_v45 = vpop.eup %445 }
  0xcd   :  { %v448_v46 = vpop.eup %447  ;;  %v372_v47 = vmul.f32 0.5, %v446_v45  ;;  %451 = vtanh.f32 %v379_v44 }
  0xce   :  { %v376_v48 = vmul.f32 0.5, %v448_v46 }
  0xcf   :  { %v373_v49 = vadd.f32 0.5, %v372_v47 }
  0xd0   :  { %v377_v51 = vadd.f32 0.5, %v376_v48 }
  0xd1   :  { %v450_v52 = vpop.eup %449 }
  0xd2   :  { %v384_v53 = vmul.f32 %v383_v50, %v377_v51  ;;  %v385_v54 = vmul.f32 %v450_v52, %v373_v49 }
  0xd3   :  { %v452_v55 = vpop.eup %451 }
  0xd4   :  { %v386_v56 = vadd.f32 %v385_v54, %v384_v53  ;;  %v381_v57 = vmul.f32 0.5, %v452_v55 }
  0xd6   :  { %389 = vst [vmem:[#allocation3] sm:$0xff] %v386_v56  ;;  %453 = vtanh.f32 %v386_v56  ;;  %v382_v58 = vadd.f32 0.5, %v381_v57 }
  0xd7   :  { %395 = vst.msk [vmem:[#allocation14] sm:$0xff] %vm106_vm0, %v386_v56 }
  0xd8   :  { %417 = dma.vmem_to_hbm [thread:$0]  %s413_s25, 128, %s415_s28, [#allocation15]  }
  0xdc   :  { %v454_v59 = vpop.eup %453 }
  0xdd   :  { %v388_v60 = vmul.f32 %v454_v59, %v382_v58 }
  0xdf   :  { %390 = vst [vmem:[#allocation2] sm:$0xff] %v388_v60 }
  0xe0   :  { %391 = vst.msk [vmem:[#allocation13] sm:$0xff] %vm106_vm0, %v388_v60 }
  0xe1   :  { %406 = dma.vmem_to_hbm [thread:$0]  %s402_s30, 128, %s404_s10, [#allocation6]  }
  0xe2   :  { %629 = dma.done.wait [#allocation6], 128  }
  0xe3   :  { %630 = vsyncadd [#allocation6], 4294967168 }
  0xe4   :  { %631 = dma.done.wait [#allocation15], 128  }
  0xe5   :  { %632 = vsyncadd [#allocation15], 4294967168 }
  0xe6   :  { %426 = vsyncpa [#allocation5], 1 }
  0xe7   :  { %427 = vsyncpa [#allocation8], 1 }
  0xe8   :  { %428 = vsyncpa [#allocation11], 1 }
  0xe9   :  { %429 = vsyncpa [#allocation6], 1 }
  0xea   :  { %430 = vsyncpa [#allocation15], 1 }

</bundles_post_ra>
